<compile_context>
chip_gen: v7x
topology: tpu7x:2x2x1
jax: 0.10.0
libtpu: 0.0.40
codegen_flags: <defaults>
</compile_context>

<pallas_src>
import functools

import jax
import jax.numpy as jnp
from jax.experimental import pallas as pl
from jax.experimental.pallas import tpu as pltpu


def _round_up(n, m):
    return (n + m - 1) // m * m


def _choose_tile(B, batch_tile):
    """Lane-aligned (multiple of 128) batch tile, adaptive to B."""
    B128 = _round_up(max(B, 1), 128)
    if B128 <= 256:
        # Tiny batch: a single full block (can't split below one 128-lane group).
        return B128
    # At least 2 grid steps (lets v7x shard across its 2 TensorCores), at most
    # ~batch_tile rows per step; size the tile from the target step count so
    # padding waste is bounded (<= ~128 rows per step) instead of snapping to a
    # fixed power of two.
    n_steps = max(2, pl.cdiv(B128, batch_tile))
    return _round_up(pl.cdiv(B128, n_steps), 128)


def mlp_kernel(xT_ref, w1t_ref, b1_ref, w2t_ref, b2_ref, w3t_ref, b3_ref, o_ref):
    # All activations carry batch on the lane axis -> lane-dense compute and store.
    xt = xT_ref[...]                                                  # (F,  TB) f32
    h1t = jnp.dot(w1t_ref[...], xt,
                  preferred_element_type=jnp.float32)                 # (H1, TB) f32
    h1t = jnp.maximum(h1t + b1_ref[...], 0.0)
    h2t = jnp.dot(w2t_ref[...], h1t,
                  preferred_element_type=jnp.float32)                 # (H2, TB) f32
    h2t = jnp.maximum(h2t + b2_ref[...], 0.0)
    logits_t = jnp.dot(w3t_ref[...], h2t,
                       preferred_element_type=jnp.float32)            # (O,  TB) f32
    logits_t = logits_t + b3_ref[...]
    o_ref[...] = jax.nn.sigmoid(logits_t).astype(o_ref.dtype)         # lane-dense store


@functools.partial(jax.jit, static_argnames=("batch_tile",))
def mlp_forward(x, w1, b1, w2, b2, w3, b3, *, batch_tile=16384):
    B, F = x.shape
    H1 = w1.shape[1]
    H2 = w2.shape[1]
    O = w3.shape[1]

    tile = _choose_tile(B, batch_tile)
    B_pad = _round_up(B, tile)
    grid = (B_pad // tile,)

    # Feature-major x (F, B_pad): one fused transpose(+pad) pass in the wrapper; the
    # kernel then reads f32 directly (no separate bf16 cast pass over x).
    xT = x.astype(jnp.float32).T                                   # (F, B)
    if B_pad != B:
        xT = jnp.pad(xT, ((0, 0), (0, B_pad - B)))

    # PyTorch-native (out, in) weight layout; biases as (out, 1) columns (lane broadcast).
    w1t = w1.T.astype(jnp.float32)                                 # (H1, F)
    w2t = w2.T.astype(jnp.float32)                                 # (H2, H1)
    w3t = w3.T.astype(jnp.float32)                                 # (O,  H2)
    b1c = b1.reshape(H1, 1).astype(jnp.float32)
    b2c = b2.reshape(H2, 1).astype(jnp.float32)
    b3c = b3.reshape(O, 1).astype(jnp.float32)

    flops = 2 * B_pad * (F * H1 + H1 * H2 + H2 * O)
    bytes_accessed = (
        B_pad * F * 4                        # x
        + B_pad * O * 4                      # output
        + (F * H1 + H1 * H2 + H2 * O) * 4    # weights
        + (H1 + H2 + O) * 4                  # biases
    )
    cost = pl.CostEstimate(flops=flops, transcendentals=B_pad,
                           bytes_accessed=bytes_accessed)

    in_specs = [
        pl.BlockSpec((F, tile), lambda i: (0, i)),   # x^T: batch tiled on the lane axis
        pl.BlockSpec((H1, F), lambda i: (0, 0)),     # W1^T (resident, constant index)
        pl.BlockSpec((H1, 1), lambda i: (0, 0)),     # b1
        pl.BlockSpec((H2, H1), lambda i: (0, 0)),    # W2^T
        pl.BlockSpec((H2, 1), lambda i: (0, 0)),     # b2
        pl.BlockSpec((O, H2), lambda i: (0, 0)),     # W3^T
        pl.BlockSpec((O, 1), lambda i: (0, 0)),      # b3
    ]
    # Output is (O, B_pad): batch on the lane axis -> unmasked, lane-dense stores.
    out_spec = pl.BlockSpec((O, tile), lambda i: (0, i))

    out_t = pl.pallas_call(
        mlp_kernel,
        out_shape=jax.ShapeDtypeStruct((O, B_pad), jnp.float32),
        grid_spec=pltpu.PrefetchScalarGridSpec(
            num_scalar_prefetch=0,
            grid=grid,
            in_specs=in_specs,
            out_specs=out_spec,
        ),
        compiler_params=pltpu.CompilerParams(
            dimension_semantics=("parallel",),        # shards steps over v7x's 2 TCs
            vmem_limit_bytes=32 * 1024 * 1024,        # ample headroom even on v7x (64 MiB)
        ),
        cost_estimate=cost,
    )(xT, w1t, b1c, w2t, b2c, w3t, b3c)

    return out_t[:, :B].T  # back to (B, O)


def init_params(key, in_features=11, hidden1=32, hidden2=32, out_features=1):
    k1, k2, k3, k4, k5, k6 = jax.random.split(key, 6)

    def lin(kw, kb, fan_in, fan_out):
        bound = 1.0 / jnp.sqrt(fan_in)
        w = jax.random.uniform(kw, (fan_in, fan_out), jnp.float32, -bound, bound)
        b = jax.random.uniform(kb, (1, fan_out), jnp.float32, -bound, bound)
        return w, b

    w1, b1 = lin(k1, k2, in_features, hidden1)
    w2, b2 = lin(k3, k4, hidden1, hidden2)
    w3, b3 = lin(k5, k6, hidden2, out_features)
    return w1, b1, w2, b2, w3, b3


def reference_forward(x, w1, b1, w2, b2, w3, b3):
    # Pure-JAX reference in the same f32 precision as the kernel.
    h1 = jnp.maximum(jnp.dot(x, w1, preferred_element_type=jnp.float32) + b1, 0.0)
    h2 = jnp.maximum(jnp.dot(h1, w2, preferred_element_type=jnp.float32) + b2, 0.0)
    logits = jnp.dot(h2, w3, preferred_element_type=jnp.float32) + b3
    return jax.nn.sigmoid(logits)


if __name__ == "__main__":
    key = jax.random.PRNGKey(0)
    kx, kp = jax.random.split(key)

    B, F = 16, 11           # 16 country rows, 11 numeric population features
    x = jax.random.normal(kx, (B, F), dtype=jnp.float32)
    params = init_params(kp, in_features=F, hidden1=32, hidden2=32, out_features=1)

    out = jax.block_until_ready(mlp_forward(x, *params))
    ref = reference_forward(x, *params)

    assert out.shape == (B, 1), out.shape
    assert jnp.allclose(out, ref, atol=1e-5, rtol=1e-5), "mismatch vs JAX reference"

    print("KERNEL_OK")
</pallas_src>

<mosaic_0001>
module attributes {stable_mosaic.version = 11 : i64} {
  func.func @mlp_kernel(%arg0: i32, %arg1: memref<11x128xf32, #tpu.memory_space<vmem>>, %arg2: memref<32x11xf32, #tpu.memory_space<vmem>>, %arg3: memref<32x1xf32, #tpu.memory_space<vmem>>, %arg4: memref<32x32xf32, #tpu.memory_space<vmem>>, %arg5: memref<32x1xf32, #tpu.memory_space<vmem>>, %arg6: memref<1x32xf32, #tpu.memory_space<vmem>>, %arg7: memref<1x1xf32, #tpu.memory_space<vmem>>, %arg8: memref<1x128xf32, #tpu.memory_space<vmem>>) attributes {dimension_semantics = [#tpu.dimension_semantics<parallel>], iteration_bounds = array<i64: 1>, scalar_prefetch = 0 : i64, scratch_operands = 0 : i64, tpu.core_type = #tpu.core_type<tc>, window_params = [{transform_indices = @transform_0, window_bounds = array<i64: 11, 128>}, {pipeline_mode = #tpu.pipeline_mode<synchronous>, transform_indices = @transform_1, window_bounds = array<i64: 32, 11>}, {pipeline_mode = #tpu.pipeline_mode<synchronous>, transform_indices = @transform_2, window_bounds = array<i64: 32, 1>}, {pipeline_mode = #tpu.pipeline_mode<synchronous>, transform_indices = @transform_3, window_bounds = array<i64: 32, 32>}, {pipeline_mode = #tpu.pipeline_mode<synchronous>, transform_indices = @transform_4, window_bounds = array<i64: 32, 1>}, {pipeline_mode = #tpu.pipeline_mode<synchronous>, transform_indices = @transform_5, window_bounds = array<i64: 1, 32>}, {pipeline_mode = #tpu.pipeline_mode<synchronous>, transform_indices = @transform_6, window_bounds = array<i64: 1, 1>}, {transform_indices = @transform_7, window_bounds = array<i64: 1, 128>}]} {
    %c0 = arith.constant 0 : index
    %c0_0 = arith.constant 0 : index
    %0 = vector.load %arg1[%c0, %c0_0] : memref<11x128xf32, #tpu.memory_space<vmem>>, vector<11x128xf32>
    %c0_1 = arith.constant 0 : index
    %c0_2 = arith.constant 0 : index
    %1 = vector.load %arg2[%c0_1, %c0_2] : memref<32x11xf32, #tpu.memory_space<vmem>>, vector<32x11xf32>
    %cst = arith.constant dense<0.000000e+00> : vector<32x128xf32>
    %2 = tpu.matmul %1, %0, %cst {dimension_numbers = #tpu.dot_dimension_numbers<[1], [0], [0], [1], [0, 0, 1, 1], [], []>} : vector<32x11xf32>, vector<11x128xf32>, vector<32x128xf32> -> vector<32x128xf32>
    %c0_3 = arith.constant 0 : index
    %c0_4 = arith.constant 0 : index
    %3 = vector.load %arg3[%c0_3, %c0_4] : memref<32x1xf32, #tpu.memory_space<vmem>>, vector<32x1xf32>
    %4 = vector.broadcast %3 : vector<32x1xf32> to vector<32x128xf32>
    %5 = arith.addf %2, %4 : vector<32x128xf32>
    %cst_5 = arith.constant 0.000000e+00 : f32
    %6 = vector.broadcast %cst_5 : f32 to vector<32x128xf32>
    %7 = arith.maximumf %5, %6 : vector<32x128xf32>
    %c0_6 = arith.constant 0 : index
    %c0_7 = arith.constant 0 : index
    %8 = vector.load %arg4[%c0_6, %c0_7] : memref<32x32xf32, #tpu.memory_space<vmem>>, vector<32x32xf32>
    %cst_8 = arith.constant dense<0.000000e+00> : vector<32x128xf32>
    %9 = tpu.matmul %8, %7, %cst_8 {dimension_numbers = #tpu.dot_dimension_numbers<[1], [0], [0], [1], [0, 0, 1, 1], [], []>} : vector<32x32xf32>, vector<32x128xf32>, vector<32x128xf32> -> vector<32x128xf32>
    %c0_9 = arith.constant 0 : index
    %c0_10 = arith.constant 0 : index
    %10 = vector.load %arg5[%c0_9, %c0_10] : memref<32x1xf32, #tpu.memory_space<vmem>>, vector<32x1xf32>
    %11 = vector.broadcast %10 : vector<32x1xf32> to vector<32x128xf32>
    %12 = arith.addf %9, %11 : vector<32x128xf32>
    %cst_11 = arith.constant 0.000000e+00 : f32
    %13 = vector.broadcast %cst_11 : f32 to vector<32x128xf32>
    %14 = arith.maximumf %12, %13 : vector<32x128xf32>
    %c0_12 = arith.constant 0 : index
    %c0_13 = arith.constant 0 : index
    %15 = vector.load %arg6[%c0_12, %c0_13] : memref<1x32xf32, #tpu.memory_space<vmem>>, vector<1x32xf32>
    %cst_14 = arith.constant dense<0.000000e+00> : vector<1x128xf32>
    %16 = tpu.matmul %15, %14, %cst_14 {dimension_numbers = #tpu.dot_dimension_numbers<[1], [0], [0], [1], [0, 0, 1, 1], [], []>} : vector<1x32xf32>, vector<32x128xf32>, vector<1x128xf32> -> vector<1x128xf32>
    %c0_15 = arith.constant 0 : index
    %c0_16 = arith.constant 0 : index
    %17 = vector.load %arg7[%c0_15, %c0_16] : memref<1x1xf32, #tpu.memory_space<vmem>>, vector<1x1xf32>
    %18 = vector.broadcast %17 : vector<1x1xf32> to vector<1x128xf32>
    %19 = arith.addf %16, %18 : vector<1x128xf32>
    %20 = arith.negf %19 : vector<1x128xf32>
    %21 = math.exp %20 : vector<1x128xf32>
    %cst_17 = arith.constant 1.000000e+00 : f32
    %22 = vector.broadcast %cst_17 : f32 to vector<1x128xf32>
    %23 = arith.addf %22, %21 : vector<1x128xf32>
    %24 = arith.divf %22, %23 : vector<1x128xf32>
    %c0_18 = arith.constant 0 : index
    %c0_19 = arith.constant 0 : index
    %25 = vector.load %arg8[%c0_18, %c0_19] : memref<1x128xf32, #tpu.memory_space<vmem>>, vector<1x128xf32>
    tpu.vector_store %arg8[%c0_18, %c0_19], %24 {strides = array<i32>} : memref<1x128xf32, #tpu.memory_space<vmem>>, vector<1x128xf32>,
    return
  }
  func.func @transform_0(%arg0: i32) -> (i32, i32) {
    %c0_i32 = arith.constant 0 : i32
    %c0_i32_0 = arith.constant 0 : i32
    return %c0_i32, %arg0 : i32, i32
  }
  func.func @transform_1(%arg0: i32) -> (i32, i32) {
    %c0_i32 = arith.constant 0 : i32
    %c0_i32_0 = arith.constant 0 : i32
    %c0_i32_1 = arith.constant 0 : i32
    return %c0_i32, %c0_i32_0 : i32, i32
  }
  func.func @transform_2(%arg0: i32) -> (i32, i32) {
    %c0_i32 = arith.constant 0 : i32
    %c0_i32_0 = arith.constant 0 : i32
    %c0_i32_1 = arith.constant 0 : i32
    return %c0_i32, %c0_i32_0 : i32, i32
  }
  func.func @transform_3(%arg0: i32) -> (i32, i32) {
    %c0_i32 = arith.constant 0 : i32
    %c0_i32_0 = arith.constant 0 : i32
    %c0_i32_1 = arith.constant 0 : i32
    return %c0_i32, %c0_i32_0 : i32, i32
  }
  func.func @transform_4(%arg0: i32) -> (i32, i32) {
    %c0_i32 = arith.constant 0 : i32
    %c0_i32_0 = arith.constant 0 : i32
    %c0_i32_1 = arith.constant 0 : i32
    return %c0_i32, %c0_i32_0 : i32, i32
  }
  func.func @transform_5(%arg0: i32) -> (i32, i32) {
    %c0_i32 = arith.constant 0 : i32
    %c0_i32_0 = arith.constant 0 : i32
    %c0_i32_1 = arith.constant 0 : i32
    return %c0_i32, %c0_i32_0 : i32, i32
  }
  func.func @transform_6(%arg0: i32) -> (i32, i32) {
    %c0_i32 = arith.constant 0 : i32
    %c0_i32_0 = arith.constant 0 : i32
    %c0_i32_1 = arith.constant 0 : i32
    return %c0_i32, %c0_i32_0 : i32, i32
  }
  func.func @transform_7(%arg0: i32) -> (i32, i32) {
    %c0_i32 = arith.constant 0 : i32
    %c0_i32_0 = arith.constant 0 : i32
    return %c0_i32, %arg0 : i32, i32
  }
}

</mosaic_0001>

<bundles_post_ra>
// kernel: mlp_forward.1
= control target key start
LH: loop header
LB: loop body
LE: loop exit
PB: predicated region body
PF: predicated region fallthrough
CT: control target
= control target key end

     0   :  { %vm71_vm0 = vcmask 1042432   ;;  %vm58_vm1 = vcmask 89088   ;;  %vm485_vm2 = vmmov 1   ;;  %v486_v2 = vmov 0   ;;  %s602_s0 = inlined_call_operand.vmem [shape: f32[11,128], index: 0, kind: input, shape index: {}]   ;;  %s603_s1 = inlined_call_operand.vmem [shape: f32[32,11], index: 1, kind: input, shape index: {}]   ;;  %s604_s2 = inlined_call_operand.vmem [shape: f32[32,1], index: 2, kind: input, shape index: {}]   ;;  %s605_s6 = inlined_call_operand.<no memory space> [shape: f32[1,1], index: 6, kind: input, shape index: {}]   ;;  %s606_s4 = inlined_call_operand.vmem [shape: f32[32,1], index: 4, kind: input, shape index: {}]   ;;  %s607_s3 = inlined_call_operand.vmem [shape: f32[32,32], index: 3, kind: input, shape index: {}]   ;;  %s608_s5 = inlined_call_operand.vmem [shape: f32[1,32], index: 5, kind: input, shape index: {}]   ;;  %s609_s7 = inlined_call_operand.vmem [shape: f32[1,128], index: 7, kind: output, shape index: {}]  }
   0x1   :  { %v28_v0 = vld [vmem:[%s602_s0] sm:$0xff]  ;;  %v29_v1 = vld [vmem:[%s602_s0 + $0x8] sm:$0x7]  ;;  %vm455_vm3 = vmpackc.low %vm71_vm0, %vm485_vm2  ;;  %479 = vset.pattern.permute.xlu0 %v486_v2  ;;  %480 = vset.pattern.permute.xlu1 %v486_v2  ;;  %v12_v3 = vstv %s605_s6  ;;  %vm192_vm4 = vcmask 261120   ;;  %v487_v40 = vmov 0.0|0.0   ;;  %vm488_vm5 = vmmov 0  }
   0x2   :  { %v454_v4 = vpack.c.bf16 %v29_v1, %v28_v0  ;;  %v30_v5 = vld [vmem:[%s603_s1] sm:$0xff]  ;;  %13 = vst [vmem:[#allocation2] sm:$0x1] %v12_v3  ;;  %v36_v7 = vld [vmem:[%s604_s2 + $0x10] sm:$0xff]  ;;  %v31_v8 = vld [vmem:[%s603_s1 + $0x8] sm:$0xff]  ;;  %v489_v41 = vmov 0.0   ;;  %v301_v61 = vlaneseq }
   0x3   :  { %423 = vmatprep.mubr.msk.f32.mxu0 %vm58_vm1, %v30_v5  ;;  %v34_v6 = vld [vmem:[%s604_s2] sm:$0xff]  ;;  %v35_v9 = vld [vmem:[%s604_s2 + $0x8] sm:$0xff]  ;;  %50 = vperm.xlu1 %480, %v36_v7   ;;  %v32_v10 = vld [vmem:[%s603_s1 + $0x10] sm:$0xff] }
   0x4   :  { %456 = vmatprep.subr.msk.bf16.mxu0 %vm455_vm3, %v454_v4  ;;  %40 = vperm.xlu0 %479, %v34_v6   ;;  %v37_v11 = vld [vmem:[%s604_s2 + $0x18] sm:$0xff]  ;;  %v168_v13 = vld [vmem:[%s606_s4] sm:$0xff]  ;;  %v169_v14 = vld [vmem:[%s606_s4 + $0x8] sm:$0xff]  ;;  %v302_v62 = vshrl.u32 %v301_v61, 7 }
   0x5   :  { %459 = vmatpush3.bf16.msk.msra.mxu0 %vm455_vm3, %v454_v4  ;;  %v33_v12 = vld [vmem:[%s603_s1 + $0x18] sm:$0xff]  ;;  %v170_v15 = vld [vmem:[%s606_s4 + $0x10] sm:$0xff]  ;;  %v164_v18 = vld [vmem:[%s607_s3] sm:$0xff] }
   0x6   :  { %v171_v16 = vld [vmem:[%s606_s4 + $0x18] sm:$0xff]  ;;  %437 = vmatprep.mubr.msk.f32.mxu1 %vm192_vm4, %v164_v18  ;;  %v165_v37 = vld [vmem:[%s607_s3 + $0x8] sm:$0xff]  ;;  %v166_v38 = vld [vmem:[%s607_s3 + $0x10] sm:$0xff]  ;;  %468 = vmatprep.subr.bf16.mxu0 %v487_v40  ;;  %v303_v63 = vsub.s32 0, %v302_v62 }
   0x7   :  { %55 = vperm.xlu1 %480, %v37_v11   ;;  %v167_v39 = vld [vmem:[%s607_s3 + $0x18] sm:$0xff]  ;;  %v294_v60 = vld [vmem:[%s608_s5] sm:$0x1] }
   0x8   :  { %424 = vmatmul.mubr.msk.f32.vlgmr.msra.gmra.mrb[0].mxu0 %vm58_vm1, %v31_v8  ;;  %45 = vperm.xlu0 %479, %v35_v9  }
   0x9   :  { %426 = vmatprep.mubr.msk.f32.mxu0 %vm58_vm1, %v32_v10  ;;  %v295_v17 = vld [vmem:[#allocation2] sm:$0x1] }
   0xb   :  { %179 = vperm.xlu1 %480, %v169_v14  }
   0xc   :  { %427 = vmatmul.mubr.msk.f32.gmra.mrb[2].mxu0 %vm58_vm1, %v33_v12  ;;  %174 = vperm.xlu0 %479, %v168_v13  }
   0xd   :  { %451 = vmatprep.mubr.msk.f32.mxu0 %vm488_vm5, %v489_v41 }
   0xf   :  { %189 = vperm.xlu1 %480, %v171_v16  }
  0x10   :  { %184 = vperm.xlu0 %479, %v170_v15  }
  0x14   :  { %298 = vperm.xlu0 %479, %v295_v17  }
  0x82   :  { %v51_v20 = vpop.permute.xlu1 %50 }
  0x83   :  { %v41_v19 = vpop.permute.xlu0 %40 }
  0x86   :  { %v56_v27 = vpop.permute.xlu1 %55 }
  0x87   :  { %v46_v21 = vpop.permute.xlu0 %45 }
  0x8a   :  { %v180_v42 = vpop.permute.xlu1 %179 }
  0x8b   :  { %v175_v43 = vpop.permute.xlu0 %174 }
  0x8e   :  { %v190_v49 = vpop.permute.xlu1 %189 }
  0x8f   :  { %v185_v52 = vpop.permute.xlu0 %184 }
  0x93   :  { %v299_v0 = vpop.permute.xlu0 %298 }
  0x94   :  { %v304_v1 = vrot.slane %v299_v0, %v303_v63 }
  0xdb   :  { %v425_v22 = vpop.f32.mrb[0].mxu0 }
  0xdc   :  { %v147_v23 = vadd.f32 %v425_v22, %v46_v21  ;;  %v141_v24 = vpop.f32.mrb[1].mxu0 }
  0xdd   :  { %v142_v25 = vadd.f32 %v141_v24, %v41_v19 }
  0xde   :  { %v161_v26 = vmax.f32 %v147_v23, 0.0 }
  0xdf   :  { %v160_v28 = vmax.f32 %v142_v25, 0.0  ;;  %v428_v29 = vpop.f32.mrb[2].mxu0 }
  0xe0   :  { %v157_v30 = vadd.f32 %v428_v29, %v56_v27  ;;  %v151_v31 = vpop.f32.mrb[3].mxu0 }
  0xe1   :  { %v152_v32 = vadd.f32 %v151_v31, %v51_v20  ;;  %v460_v33 = vpack.c.bf16 %v161_v26, %v160_v28 }
  0xe2   :  { %v163_v34 = vmax.f32 %v157_v30, 0.0 }
  0xe3   :  { %v162_v35 = vmax.f32 %v152_v32, 0.0  ;;  %461 = vmatprep.subr.bf16.mxu1 %v460_v33 }
  0xe4   :  { %463 = vmatpush3.bf16.msra.mxu1 %v460_v33 }
  0xe5   :  { %v464_v36 = vpack.c.bf16 %v163_v34, %v162_v35 }
  0xe7   :  { %465 = vmatprep.subr.bf16.mxu1 %v464_v36 }
  0xe8   :  { %467 = vmatpush3.bf16.msra.mxu1 %v464_v36 }
  0xeb   :  { %438 = vmatmul.mubr.msk.f32.vlgmr.msra.gmra.mrb[0].mxu1 %vm192_vm4, %v165_v37 }
  0xec   :  { %440 = vmatprep.mubr.msk.f32.mxu1 %vm192_vm4, %v166_v38 }
  0xef   :  { %441 = vmatmul.mubr.msk.f32.gmra.mrb[2].mxu1 %vm192_vm4, %v167_v39 }
 0x1be   :  { %v439_v44 = vpop.f32.mrb[0].mxu1 }
 0x1bf   :  { %v277_v45 = vadd.f32 %v439_v44, %v180_v42  ;;  %v271_v46 = vpop.f32.mrb[1].mxu1 }
 0x1c0   :  { %v272_v47 = vadd.f32 %v271_v46, %v175_v43 }
 0x1c1   :  { %v291_v48 = vmax.f32 %v277_v45, 0.0 }
 0x1c2   :  { %v290_v50 = vmax.f32 %v272_v47, 0.0  ;;  %v442_v51 = vpop.f32.mrb[2].mxu1 }
 0x1c3   :  { %v287_v53 = vadd.f32 %v442_v51, %v190_v49  ;;  %v281_v54 = vpop.f32.mrb[3].mxu1 }
 0x1c4   :  { %v469_v55 = vpack.c.bf16 %v291_v48, %v290_v50  ;;  %v282_v56 = vadd.f32 %v281_v54, %v185_v52 }
 0x1c5   :  { %v293_v57 = vmax.f32 %v287_v53, 0.0 }
 0x1c6   :  { %v292_v58 = vmax.f32 %v282_v56, 0.0  ;;  %470 = vmatpush3.bf16.msra.mxu0 %v469_v55 }
 0x1c7   :  { %471 = vmatprep.subr.bf16.mxu0 %v487_v40 }
 0x1c8   :  { %v472_v59 = vpack.c.bf16 %v293_v57, %v292_v58 }
 0x1ca   :  { %473 = vmatpush3.bf16.msra.mxu0 %v472_v59 }
 0x1cd   :  { %452 = vmatmul.mubr.msk.f32.vlgmr.msra.gmra.mrb[4].mxu0 %vm192_vm4, %v294_v60 }
 0x2a0   :  { %v374_v2 = vpop.f32.mrb[4].mxu0 }
 0x2a1   :  { %v375_v3 = vadd.f32 %v374_v2, %v304_v1  ;;  %v453_v4 = vpop.f32.mrb[5].mxu0 }
 0x2a3   :  { %v399_v5 = vmul.f32 -1.442695, %v375_v3 }
 0x2a5   :  { %481 = vpow2.f32 %v399_v5 }
 0x2af   :  { %v482_v6 = vpop.eup %481 }
 0x2b0   :  { %v381_v7 = vadd.f32 1.0, %v482_v6 }
 0x2b2   :  { %483 = vrcp.f32 %v381_v7 }
 0x2bc   :  { %v484_v8 = vpop.eup %483 }
 0x2bd   :  { %384 = vst [vmem:[%s609_s7] sm:$0x1] %v484_v8 }

</bundles_post_ra>
